<compile_context>
chip_gen: v7x
topology: tpu7x:2x2x1
jax: 0.10.0
libtpu: 0.0.40
codegen_flags: <defaults>
</compile_context>

<pallas_src>
from functools import partial

import jax
import jax.numpy as jnp
from jax.experimental import pallas as pl
from jax.experimental.pallas import tpu as pltpu


def _asp_kernel(x_ref, w_in_ref, b_in_ref, w_out_ref, b_out_ref,
                means_ref, stds_ref, *, eps, block_b):
    # x_ref:      (block_b, DE, T)  channel-major utterance block
    # w_in_ref:   (H, DE)           torch-native in_linear.weight
    # b_in_ref:   (H, 1)
    # w_out_ref:  (DE, H)           torch-native out_linear.weight
    # b_out_ref:  (DE, 1)
    # means_ref:  (1, DE, block_b)  channel-major weighted means
    # stds_ref:   (1, DE, block_b)  channel-major weighted stds
    w_in = w_in_ref[...]
    b_in = b_in_ref[...]
    w_out = w_out_ref[...]
    b_out = b_out_ref[...]

    # Short fixed trip count -> unrolled at trace time; each iteration is two
    # MXU matmuls + lane-axis softmax/statistics for one utterance.
    for b in range(block_b):
        x_b = x_ref[b]                                                     # [DE, T]

        # energies (channel-major): out_linear(tanh(in_linear(x^T)))^T
        h = jnp.tanh(
            jnp.dot(w_in, x_b, preferred_element_type=jnp.float32) + b_in)  # [H, T]
        e = jnp.dot(w_out, h, preferred_element_type=jnp.float32) + b_out   # [DE, T]

        # softmax over time (lane axis), kept UNNORMALIZED; normalization is
        # folded into the statistics via a [DE,1] reciprocal (EUP) below.
        p = jnp.exp(e - jnp.max(e, axis=1, keepdims=True))                  # [DE, T]
        s = jnp.sum(p, axis=1, keepdims=True)                               # [DE, 1]
        inv_s = pl.reciprocal(s, approx=False)  # approx=True if ~1e-4 error is OK

        px = p * x_b
        mean = jnp.sum(px, axis=1, keepdims=True) * inv_s                   # [DE, 1]
        ex2 = jnp.sum(px * x_b, axis=1, keepdims=True) * inv_s              # [DE, 1]
        var = ex2 - mean * mean
        std = jnp.sqrt(jnp.maximum(var, eps))  # residuals.clamp(min=eps).sqrt()

        means_ref[0, :, b:b + 1] = mean
        stds_ref[0, :, b:b + 1] = std


def _pick_block_b(batch, cap=8):
    # Largest divisor of `batch` not exceeding `cap` (avoids any batch padding /
    # extra input copies; worst case falls back to 1 utterance per step).
    for d in range(min(batch, cap), 0, -1):
        if batch % d == 0:
            return d
    return 1


def attentive_stats_pooling(encodings, w_in, b_in, w_out, b_out,
                            eps=1e-6, block_b=None, vmem_limit_bytes=None):
    """encodings: [B, DE, T] f32 -> pooled [B, 2*DE] f32 (concat of means, stds).

    Weights are in torch-native nn.Linear layout ([out_features, in_features]):
      w_in:  [H, DE],  b_in:  [H]
      w_out: [DE, H],  b_out: [DE]
    """
    B, DE, T = encodings.shape
    H = w_in.shape[0]
    assert w_in.shape == (H, DE) and w_out.shape == (DE, H)
    assert b_in.shape == (H,) and b_out.shape == (DE,)

    if block_b is None:
        # Reduce block_b for very large DE*T (e.g. v7x 64 MiB VMEM) if needed.
        block_b = _pick_block_b(B)
    assert B % block_b == 0, (B, block_b)
    nb = B // block_b

    x = encodings.astype(jnp.float32)
    w_in_f = w_in.astype(jnp.float32)
    w_out_f = w_out.astype(jnp.float32)
    b_in2 = b_in.reshape(H, 1).astype(jnp.float32)    # column bias for [H, T]
    b_out2 = b_out.reshape(DE, 1).astype(jnp.float32)  # column bias for [DE, T]

    cost = pl.CostEstimate(
        flops=4 * B * T * DE * H,                       # two GEMMs per utterance
        transcendentals=B * T * (H + DE),               # tanh + exp
        bytes_accessed=4 * (B * DE * T + 2 * DE * H + DE + H + 2 * B * DE),
    )

    compiler_kwargs = dict(dimension_semantics=("parallel",))
    if vmem_limit_bytes is not None:
        compiler_kwargs["vmem_limit_bytes"] = vmem_limit_bytes

    means_t, stds_t = pl.pallas_call(
        partial(_asp_kernel, eps=eps, block_b=block_b),
        out_shape=(
            jax.ShapeDtypeStruct((nb, DE, block_b), jnp.float32),
            jax.ShapeDtypeStruct((nb, DE, block_b), jnp.float32),
        ),
        grid_spec=pltpu.PrefetchScalarGridSpec(
            num_scalar_prefetch=0,
            grid=(nb,),
            in_specs=[
                pl.BlockSpec((block_b, DE, T), lambda i: (i, 0, 0)),  # encodings
                pl.BlockSpec((H, DE), lambda i: (0, 0)),              # in_linear.weight
                pl.BlockSpec((H, 1), lambda i: (0, 0)),               # in_linear.bias
                pl.BlockSpec((DE, H), lambda i: (0, 0)),              # out_linear.weight
                pl.BlockSpec((DE, 1), lambda i: (0, 0)),              # out_linear.bias
            ],
            out_specs=[
                pl.BlockSpec((1, DE, block_b), lambda i: (i, 0, 0)),  # means (ch-major)
                pl.BlockSpec((1, DE, block_b), lambda i: (i, 0, 0)),  # stds  (ch-major)
            ],
        ),
        compiler_params=pltpu.CompilerParams(**compiler_kwargs),
        cost_estimate=cost,
    )(x, w_in_f, b_in2, w_out_f, b_out2)

    # Tiny post-processing on ~2*B*DE floats: channel-major -> [B, 2*DE].
    means = jnp.transpose(means_t, (0, 2, 1)).reshape(B, DE)
    stds = jnp.transpose(stds_t, (0, 2, 1)).reshape(B, DE)
    return jnp.concatenate([means, stds], axis=1)


def _reference(encodings, w_in, b_in, w_out, b_out, eps=1e-6):
    # Pure-JAX transcription of the PyTorch forward (torch-native weight layout).
    x = jnp.transpose(encodings, (0, 2, 1))                      # [B, T, DE]
    h = jnp.tanh(x @ w_in.T + b_in)                              # [B, T, H]
    energies = jnp.transpose(h @ w_out.T + b_out, (0, 2, 1))     # [B, DE, T]
    alphas = jax.nn.softmax(energies, axis=2)
    means = jnp.sum(alphas * encodings, axis=2)
    residuals = jnp.sum(alphas * encodings ** 2, axis=2) - means ** 2
    stds = jnp.sqrt(jnp.clip(residuals, eps, None))
    return jnp.concatenate([means, stds], axis=1)


if __name__ == "__main__":
    B, DE, T, H = 2, 16, 8, 32  # batch, encoding size (input_size), time, hidden_size

    key = jax.random.PRNGKey(0)
    k_enc, k_wi, k_bi, k_wo, k_bo = jax.random.split(key, 5)

    encodings = jax.random.normal(k_enc, (B, DE, T), dtype=jnp.float32)
    # torch-native nn.Linear weight layouts: [out_features, in_features].
    w_in = 0.1 * jax.random.normal(k_wi, (H, DE), dtype=jnp.float32)
    b_in = 0.1 * jax.random.normal(k_bi, (H,), dtype=jnp.float32)
    w_out = 0.1 * jax.random.normal(k_wo, (DE, H), dtype=jnp.float32)
    b_out = 0.1 * jax.random.normal(k_bo, (DE,), dtype=jnp.float32)

    out = attentive_stats_pooling(encodings, w_in, b_in, w_out, b_out)
    out = jax.block_until_ready(out)

    ref = _reference(encodings, w_in, b_in, w_out, b_out)
    assert out.shape == (B, 2 * DE), out.shape
    max_err = jnp.max(jnp.abs(out - ref))
    assert jnp.allclose(out, ref, atol=1e-5, rtol=1e-5), f"max abs err = {max_err}"

    print("KERNEL_OK")
</pallas_src>

<mosaic_0001>
module attributes {stable_mosaic.version = 11 : i64} {
  func.func @_asp_kernel(%arg0: i32, %arg1: memref<2x16x8xf32, #tpu.memory_space<vmem>>, %arg2: memref<32x16xf32, #tpu.memory_space<vmem>>, %arg3: memref<32x1xf32, #tpu.memory_space<vmem>>, %arg4: memref<16x32xf32, #tpu.memory_space<vmem>>, %arg5: memref<16x1xf32, #tpu.memory_space<vmem>>, %arg6: memref<1x16x2xf32, #tpu.memory_space<vmem>>, %arg7: memref<1x16x2xf32, #tpu.memory_space<vmem>>) attributes {dimension_semantics = [#tpu.dimension_semantics<parallel>], iteration_bounds = array<i64: 1>, scalar_prefetch = 0 : i64, scratch_operands = 0 : i64, tpu.core_type = #tpu.core_type<tc>, window_params = [{transform_indices = @transform_0, window_bounds = array<i64: 2, 16, 8>}, {pipeline_mode = #tpu.pipeline_mode<synchronous>, transform_indices = @transform_1, window_bounds = array<i64: 32, 16>}, {pipeline_mode = #tpu.pipeline_mode<synchronous>, transform_indices = @transform_2, window_bounds = array<i64: 32, 1>}, {pipeline_mode = #tpu.pipeline_mode<synchronous>, transform_indices = @transform_3, window_bounds = array<i64: 16, 32>}, {pipeline_mode = #tpu.pipeline_mode<synchronous>, transform_indices = @transform_4, window_bounds = array<i64: 16, 1>}, {transform_indices = @transform_5, window_bounds = array<i64: 1, 16, 2>}, {transform_indices = @transform_6, window_bounds = array<i64: 1, 16, 2>}]} {
    %c0 = arith.constant 0 : index
    %c0_0 = arith.constant 0 : index
    %0 = vector.load %arg2[%c0, %c0_0] : memref<32x16xf32, #tpu.memory_space<vmem>>, vector<32x16xf32>
    %c0_1 = arith.constant 0 : index
    %c0_2 = arith.constant 0 : index
    %1 = vector.load %arg3[%c0_1, %c0_2] : memref<32x1xf32, #tpu.memory_space<vmem>>, vector<32x1xf32>
    %c0_3 = arith.constant 0 : index
    %c0_4 = arith.constant 0 : index
    %2 = vector.load %arg4[%c0_3, %c0_4] : memref<16x32xf32, #tpu.memory_space<vmem>>, vector<16x32xf32>
    %c0_5 = arith.constant 0 : index
    %c0_6 = arith.constant 0 : index
    %3 = vector.load %arg5[%c0_5, %c0_6] : memref<16x1xf32, #tpu.memory_space<vmem>>, vector<16x1xf32>
    %c0_7 = arith.constant 0 : index
    %c0_8 = arith.constant 0 : index
    %c0_9 = arith.constant 0 : index
    %4 = vector.load %arg1[%c0_7, %c0_8, %c0_9] : memref<2x16x8xf32, #tpu.memory_space<vmem>>, vector<1x16x8xf32>
    %5 = vector.shape_cast %4 : vector<1x16x8xf32> to vector<16x8xf32>
    %cst = arith.constant dense<0.000000e+00> : vector<32x8xf32>
    %6 = tpu.matmul %0, %5, %cst {dimension_numbers = #tpu.dot_dimension_numbers<[1], [0], [0], [1], [0, 0, 1, 1], [], []>} : vector<32x16xf32>, vector<16x8xf32>, vector<32x8xf32> -> vector<32x8xf32>
    %7 = vector.broadcast %1 : vector<32x1xf32> to vector<32x8xf32>
    %8 = arith.addf %6, %7 : vector<32x8xf32>
    %9 = math.tanh %8 : vector<32x8xf32>
    %cst_10 = arith.constant dense<0.000000e+00> : vector<16x8xf32>
    %10 = tpu.matmul %2, %9, %cst_10 {dimension_numbers = #tpu.dot_dimension_numbers<[1], [0], [0], [1], [0, 0, 1, 1], [], []>} : vector<16x32xf32>, vector<32x8xf32>, vector<16x8xf32> -> vector<16x8xf32>
    %11 = vector.broadcast %3 : vector<16x1xf32> to vector<16x8xf32>
    %12 = arith.addf %10, %11 : vector<16x8xf32>
    %cst_11 = arith.constant dense<0xFF800000> : vector<16xf32>
    %13 = vector.multi_reduction <maximumf>, %12, %cst_11 [1] : vector<16x8xf32> to vector<16xf32>
    %14 = vector.shape_cast %13 : vector<16xf32> to vector<16x1xf32>
    %15 = vector.broadcast %14 : vector<16x1xf32> to vector<16x8xf32>
    %16 = arith.subf %12, %15 : vector<16x8xf32>
    %17 = math.exp %16 : vector<16x8xf32>
    %cst_12 = arith.constant dense<0.000000e+00> : vector<16xf32>
    %18 = vector.multi_reduction <add>, %17, %cst_12 [1] : vector<16x8xf32> to vector<16xf32>
    %19 = vector.shape_cast %18 : vector<16xf32> to vector<16x1xf32>
    %20 = tpu.reciprocal %19 : vector<16x1xf32> -> vector<16x1xf32>
    %21 = arith.mulf %17, %5 : vector<16x8xf32>
    %cst_13 = arith.constant dense<0.000000e+00> : vector<16xf32>
    %22 = vector.multi_reduction <add>, %21, %cst_13 [1] : vector<16x8xf32> to vector<16xf32>
    %23 = vector.shape_cast %22 : vector<16xf32> to vector<16x1xf32>
    %24 = arith.mulf %23, %20 : vector<16x1xf32>
    %25 = arith.mulf %21, %5 : vector<16x8xf32>
    %cst_14 = arith.constant dense<0.000000e+00> : vector<16xf32>
    %26 = vector.multi_reduction <add>, %25, %cst_14 [1] : vector<16x8xf32> to vector<16xf32>
    %27 = vector.shape_cast %26 : vector<16xf32> to vector<16x1xf32>
    %28 = arith.mulf %27, %20 : vector<16x1xf32>
    %29 = arith.mulf %24, %24 : vector<16x1xf32>
    %30 = arith.subf %28, %29 : vector<16x1xf32>
    %cst_15 = arith.constant 9.99999997E-7 : f32
    %31 = vector.broadcast %cst_15 : f32 to vector<16x1xf32>
    %32 = arith.maximumf %30, %31 : vector<16x1xf32>
    %33 = math.sqrt %32 : vector<16x1xf32>
    %c0_16 = arith.constant 0 : index
    %c0_17 = arith.constant 0 : index
    %c0_18 = arith.constant 0 : index
    %34 = vector.load %arg6[%c0_16, %c0_17, %c0_18] : memref<1x16x2xf32, #tpu.memory_space<vmem>>, vector<1x16x1xf32>
    %35 = vector.shape_cast %34 : vector<1x16x1xf32> to vector<16x1xf32>
    %36 = vector.shape_cast %24 : vector<16x1xf32> to vector<1x16x1xf32>
    tpu.vector_store %arg6[%c0_16, %c0_17, %c0_18], %36 {strides = array<i32>} : memref<1x16x2xf32, #tpu.memory_space<vmem>>, vector<1x16x1xf32>,
    %c0_19 = arith.constant 0 : index
    %c0_20 = arith.constant 0 : index
    %c0_21 = arith.constant 0 : index
    %37 = vector.load %arg7[%c0_19, %c0_20, %c0_21] : memref<1x16x2xf32, #tpu.memory_space<vmem>>, vector<1x16x1xf32>
    %38 = vector.shape_cast %37 : vector<1x16x1xf32> to vector<16x1xf32>
    %39 = vector.shape_cast %33 : vector<16x1xf32> to vector<1x16x1xf32>
    tpu.vector_store %arg7[%c0_19, %c0_20, %c0_21], %39 {strides = array<i32>} : memref<1x16x2xf32, #tpu.memory_space<vmem>>, vector<1x16x1xf32>,
    %c1 = arith.constant 1 : index
    %c0_22 = arith.constant 0 : index
    %c0_23 = arith.constant 0 : index
    %40 = vector.load %arg1[%c1, %c0_22, %c0_23] : memref<2x16x8xf32, #tpu.memory_space<vmem>>, vector<1x16x8xf32>
    %41 = vector.shape_cast %40 : vector<1x16x8xf32> to vector<16x8xf32>
    %cst_24 = arith.constant dense<0.000000e+00> : vector<32x8xf32>
    %42 = tpu.matmul %0, %41, %cst_24 {dimension_numbers = #tpu.dot_dimension_numbers<[1], [0], [0], [1], [0, 0, 1, 1], [], []>} : vector<32x16xf32>, vector<16x8xf32>, vector<32x8xf32> -> vector<32x8xf32>
    %43 = vector.broadcast %1 : vector<32x1xf32> to vector<32x8xf32>
    %44 = arith.addf %42, %43 : vector<32x8xf32>
    %45 = math.tanh %44 : vector<32x8xf32>
    %cst_25 = arith.constant dense<0.000000e+00> : vector<16x8xf32>
    %46 = tpu.matmul %2, %45, %cst_25 {dimension_numbers = #tpu.dot_dimension_numbers<[1], [0], [0], [1], [0, 0, 1, 1], [], []>} : vector<16x32xf32>, vector<32x8xf32>, vector<16x8xf32> -> vector<16x8xf32>
    %47 = vector.broadcast %3 : vector<16x1xf32> to vector<16x8xf32>
    %48 = arith.addf %46, %47 : vector<16x8xf32>
    %cst_26 = arith.constant dense<0xFF800000> : vector<16xf32>
    %49 = vector.multi_reduction <maximumf>, %48, %cst_26 [1] : vector<16x8xf32> to vector<16xf32>
    %50 = vector.shape_cast %49 : vector<16xf32> to vector<16x1xf32>
    %51 = vector.broadcast %50 : vector<16x1xf32> to vector<16x8xf32>
    %52 = arith.subf %48, %51 : vector<16x8xf32>
    %53 = math.exp %52 : vector<16x8xf32>
    %cst_27 = arith.constant dense<0.000000e+00> : vector<16xf32>
    %54 = vector.multi_reduction <add>, %53, %cst_27 [1] : vector<16x8xf32> to vector<16xf32>
    %55 = vector.shape_cast %54 : vector<16xf32> to vector<16x1xf32>
    %56 = tpu.reciprocal %55 : vector<16x1xf32> -> vector<16x1xf32>
    %57 = arith.mulf %53, %41 : vector<16x8xf32>
    %cst_28 = arith.constant dense<0.000000e+00> : vector<16xf32>
    %58 = vector.multi_reduction <add>, %57, %cst_28 [1] : vector<16x8xf32> to vector<16xf32>
    %59 = vector.shape_cast %58 : vector<16xf32> to vector<16x1xf32>
    %60 = arith.mulf %59, %56 : vector<16x1xf32>
    %61 = arith.mulf %57, %41 : vector<16x8xf32>
    %cst_29 = arith.constant dense<0.000000e+00> : vector<16xf32>
    %62 = vector.multi_reduction <add>, %61, %cst_29 [1] : vector<16x8xf32> to vector<16xf32>
    %63 = vector.shape_cast %62 : vector<16xf32> to vector<16x1xf32>
    %64 = arith.mulf %63, %56 : vector<16x1xf32>
    %65 = arith.mulf %60, %60 : vector<16x1xf32>
    %66 = arith.subf %64, %65 : vector<16x1xf32>
    %cst_30 = arith.constant 9.99999997E-7 : f32
    %67 = vector.broadcast %cst_30 : f32 to vector<16x1xf32>
    %68 = arith.maximumf %66, %67 : vector<16x1xf32>
    %69 = math.sqrt %68 : vector<16x1xf32>
    %c0_31 = arith.constant 0 : index
    %c0_32 = arith.constant 0 : index
    %c1_33 = arith.constant 1 : index
    %70 = vector.load %arg6[%c0_31, %c0_32, %c1_33] : memref<1x16x2xf32, #tpu.memory_space<vmem>>, vector<1x16x1xf32>
    %71 = vector.shape_cast %70 : vector<1x16x1xf32> to vector<16x1xf32>
    %72 = vector.shape_cast %60 : vector<16x1xf32> to vector<1x16x1xf32>
    tpu.vector_store %arg6[%c0_31, %c0_32, %c1_33], %72 {strides = array<i32>} : memref<1x16x2xf32, #tpu.memory_space<vmem>>, vector<1x16x1xf32>,
    %c0_34 = arith.constant 0 : index
    %c0_35 = arith.constant 0 : index
    %c1_36 = arith.constant 1 : index
    %73 = vector.load %arg7[%c0_34, %c0_35, %c1_36] : memref<1x16x2xf32, #tpu.memory_space<vmem>>, vector<1x16x1xf32>
    %74 = vector.shape_cast %73 : vector<1x16x1xf32> to vector<16x1xf32>
    %75 = vector.shape_cast %69 : vector<16x1xf32> to vector<1x16x1xf32>
    tpu.vector_store %arg7[%c0_34, %c0_35, %c1_36], %75 {strides = array<i32>} : memref<1x16x2xf32, #tpu.memory_space<vmem>>, vector<1x16x1xf32>,
    return
  }
  func.func @transform_0(%arg0: i32) -> (i32, i32, i32) {
    %c0_i32 = arith.constant 0 : i32
    %c0_i32_0 = arith.constant 0 : i32
    %c0_i32_1 = arith.constant 0 : i32
    return %arg0, %c0_i32, %c0_i32_0 : i32, i32, i32
  }
  func.func @transform_1(%arg0: i32) -> (i32, i32) {
    %c0_i32 = arith.constant 0 : i32
    %c0_i32_0 = arith.constant 0 : i32
    %c0_i32_1 = arith.constant 0 : i32
    return %c0_i32, %c0_i32_0 : i32, i32
  }
  func.func @transform_2(%arg0: i32) -> (i32, i32) {
    %c0_i32 = arith.constant 0 : i32
    %c0_i32_0 = arith.constant 0 : i32
    %c0_i32_1 = arith.constant 0 : i32
    return %c0_i32, %c0_i32_0 : i32, i32
  }
  func.func @transform_3(%arg0: i32) -> (i32, i32) {
    %c0_i32 = arith.constant 0 : i32
    %c0_i32_0 = arith.constant 0 : i32
    %c0_i32_1 = arith.constant 0 : i32
    return %c0_i32, %c0_i32_0 : i32, i32
  }
  func.func @transform_4(%arg0: i32) -> (i32, i32) {
    %c0_i32 = arith.constant 0 : i32
    %c0_i32_0 = arith.constant 0 : i32
    %c0_i32_1 = arith.constant 0 : i32
    return %c0_i32, %c0_i32_0 : i32, i32
  }
  func.func @transform_5(%arg0: i32) -> (i32, i32, i32) {
    %c0_i32 = arith.constant 0 : i32
    %c0_i32_0 = arith.constant 0 : i32
    %c0_i32_1 = arith.constant 0 : i32
    return %arg0, %c0_i32, %c0_i32_0 : i32, i32, i32
  }
  func.func @transform_6(%arg0: i32) -> (i32, i32, i32) {
    %c0_i32 = arith.constant 0 : i32
    %c0_i32_0 = arith.constant 0 : i32
    %c0_i32_1 = arith.constant 0 : i32
    return %arg0, %c0_i32, %c0_i32_0 : i32, i32, i32
  }
}

</mosaic_0001>

<bundles_post_ra>
// kernel: tpu_custom_call.1
= control target key start
LH: loop header
LB: loop body
LE: loop exit
PB: predicated region body
PF: predicated region fallthrough
CT: control target
= control target key end

     0   :  { %vm56_vm0 = vcmask 130048   ;;  %v703_v3 = vmov 0   ;;  %vm168_vm1 = vcmask 261120   ;;  %vm250_vm2 = vcmask 64512   ;;  %s867_s0 = inlined_call_operand.vmem [shape: f32[2,16,8], index: 0, kind: input, shape index: {}]   ;;  %s868_s1 = inlined_call_operand.vmem [shape: f32[32,16], index: 1, kind: input, shape index: {}]   ;;  %s869_s2 = inlined_call_operand.vmem [shape: f32[32,1], index: 2, kind: input, shape index: {}]   ;;  %s870_s4 = inlined_call_operand.vmem [shape: f32[16,1], index: 4, kind: input, shape index: {}]   ;;  %s871_s3 = inlined_call_operand.vmem [shape: f32[16,32], index: 3, kind: input, shape index: {}]   ;;  %s872_s5 = inlined_call_operand.vmem [shape: f32[1,16,2], index: 5, kind: output, shape index: {0}]   ;;  %s873_s6 = inlined_call_operand.vmem [shape: f32[1,16,2], index: 6, kind: output, shape index: {1}]  }
   0x1   :  { %v742_v0 = vld [vmem:[%s867_s0] sm:$0xff]  ;;  %v747_v1 = vld [vmem:[%s867_s0 + $0x8] sm:$0xff]  ;;  %661 = vset.pattern.permute.xlu0 %v703_v3  ;;  %662 = vset.pattern.permute.xlu1 %v703_v3  ;;  %v758_v5 = vld [vmem:[%s867_s0 + $0x10] sm:$0xff]  ;;  %vm311_vm3 = vcmask 7168   ;;  %vm543_vm4 = vcmask 15368  }
   0x2   :  { %v22_v2 = vld [vmem:[%s868_s1] sm:$0xff]  ;;  %v636_v4 = vpack.c.bf16 %v747_v1, %v742_v0  ;;  %v763_v6 = vld [vmem:[%s867_s0 + $0x18] sm:$0xff]  ;;  %v28_v9 = vld [vmem:[%s869_s2 + $0x10] sm:$0xff] }
   0x3   :  { %598 = vmatprep.mubr.msk.f32.mxu0 %vm56_vm0, %v22_v2  ;;  %v648_v7 = vpack.c.bf16 %v763_v6, %v758_v5  ;;  %v26_v8 = vld [vmem:[%s869_s2] sm:$0xff]  ;;  %v23_v10 = vld [vmem:[%s868_s1 + $0x8] sm:$0xff]  ;;  %48 = vperm.xlu1 %662, %v28_v9   ;;  %v24_v12 = vld [vmem:[%s868_s1 + $0x10] sm:$0xff] }
   0x4   :  { %637 = vmatprep.subr.bf16.mxu0 %v636_v4  ;;  %38 = vperm.xlu0 %661, %v26_v8   ;;  %v27_v11 = vld [vmem:[%s869_s2 + $0x8] sm:$0xff]  ;;  %v29_v13 = vld [vmem:[%s869_s2 + $0x18] sm:$0xff]  ;;  %v32_v15 = vld [vmem:[%s870_s4] sm:$0xff] }
   0x5   :  { %639 = vmatpush3.bf16.msra.mxu0 %v636_v4  ;;  %v25_v14 = vld [vmem:[%s868_s1 + $0x18] sm:$0xff]  ;;  %v33_v16 = vld [vmem:[%s870_s4 + $0x8] sm:$0xff]  ;;  %v30_v17 = vld [vmem:[%s871_s3] sm:$0xff] }
   0x6   :  { %649 = vmatprep.subr.bf16.mxu0 %v648_v7  ;;  %612 = vmatprep.mubr.msk.f32.mxu1 %vm168_vm1, %v30_v17  ;;  %v31_v46 = vld [vmem:[%s871_s3 + $0x8] sm:$0xff] }
   0x7   :  { %53 = vperm.xlu1 %662, %v29_v13  }
   0x8   :  { %599 = vmatmul.mubr.msk.f32.vlgmr.msra.gmra.mrb[0].mxu0 %vm56_vm0, %v23_v10  ;;  %43 = vperm.xlu0 %661, %v27_v11  }
   0x9   :  { %651 = vmatpush3.bf16.msra.mxu0 %v648_v7  ;;  %601 = vmatprep.mubr.msk.f32.mxu0 %vm56_vm0, %v24_v12 }
   0xb   :  { %165 = vperm.xlu1 %662, %v33_v16  }
   0xc   :  { %602 = vmatmul.mubr.msk.f32.gmra.mrb[2].mxu0 %vm56_vm0, %v25_v14  ;;  %160 = vperm.xlu0 %661, %v32_v15  }
   0xd   :  { %619 = vmatprep.mubr.msk.f32.mxu0 %vm56_vm0, %v22_v2 }
  0x10   :  { %620 = vmatmul.mubr.msk.f32.vlgmr.msra.gmra.mrb[4].mxu0 %vm56_vm0, %v23_v10 }
  0x11   :  { %622 = vmatprep.mubr.msk.f32.mxu0 %vm56_vm0, %v24_v12 }
  0x14   :  { %623 = vmatmul.mubr.msk.f32.gmra.mrb[6].mxu0 %vm56_vm0, %v25_v14 }
  0x82   :  { %v49_v19 = vpop.permute.xlu1 %48 }
  0x83   :  { %v39_v18 = vpop.permute.xlu0 %38 }
  0x86   :  { %v54_v25 = vpop.permute.xlu1 %53 }
  0x87   :  { %v44_v20 = vpop.permute.xlu0 %43 }
  0x8a   :  { %v166_v51 = vpop.permute.xlu1 %165 }
  0x8b   :  { %v161_v53 = vpop.permute.xlu0 %160 }
  0xdb   :  { %v600_v21 = vpop.f32.mrb[0].mxu0 }
  0xdc   :  { %v141_v22 = vadd.f32 %v600_v21, %v44_v20  ;;  %v135_v23 = vpop.f32.mrb[1].mxu0 }
  0xdd   :  { %v136_v24 = vadd.f32 %v135_v23, %v39_v18 }
  0xde   :  { %663 = vtanh.f32 %v141_v22 }
  0xdf   :  { %665 = vtanh.f32 %v136_v24  ;;  %v603_v26 = vpop.f32.mrb[2].mxu0 }
  0xe0   :  { %v151_v27 = vadd.f32 %v603_v26, %v54_v25  ;;  %v145_v28 = vpop.f32.mrb[3].mxu0 }
  0xe1   :  { %v146_v29 = vadd.f32 %v145_v28, %v49_v19 }
  0xe2   :  { %667 = vtanh.f32 %v151_v27 }
  0xe3   :  { %669 = vtanh.f32 %v146_v29  ;;  %v621_v30 = vpop.f32.mrb[4].mxu0 }
  0xe4   :  { %v391_v31 = vadd.f32 %v621_v30, %v44_v20  ;;  %v385_v32 = vpop.f32.mrb[5].mxu0 }
  0xe5   :  { %v386_v33 = vadd.f32 %v385_v32, %v39_v18 }
  0xe6   :  { %671 = vtanh.f32 %v391_v31 }
  0xe7   :  { %673 = vtanh.f32 %v386_v33  ;;  %v624_v34 = vpop.f32.mrb[6].mxu0 }
  0xe8   :  { %v664_v35 = vpop.eup %663  ;;  %v401_v36 = vadd.f32 %v624_v34, %v54_v25  ;;  %v395_v37 = vpop.f32.mrb[7].mxu0 }
  0xe9   :  { %v666_v38 = vpop.eup %665  ;;  %v396_v39 = vadd.f32 %v395_v37, %v49_v19 }
  0xea   :  { %675 = vtanh.f32 %v401_v36  ;;  %v640_v40 = vpack.c.bf16 %v664_v35, %v666_v38 }
  0xeb   :  { %677 = vtanh.f32 %v396_v39 }
  0xec   :  { %v668_v41 = vpop.eup %667  ;;  %641 = vmatprep.subr.bf16.mxu1 %v640_v40 }
  0xed   :  { %v670_v42 = vpop.eup %669  ;;  %643 = vmatpush3.bf16.msra.mxu1 %v640_v40 }
  0xee   :  { %v644_v43 = vpack.c.bf16 %v668_v41, %v670_v42 }
  0xf0   :  { %v672_v44 = vpop.eup %671  ;;  %645 = vmatprep.subr.bf16.mxu1 %v644_v43 }
  0xf1   :  { %v674_v45 = vpop.eup %673  ;;  %647 = vmatpush3.bf16.msra.mxu1 %v644_v43 }
  0xf2   :  { %v652_v47 = vpack.c.bf16 %v672_v44, %v674_v45 }
  0xf4   :  { %v676_v48 = vpop.eup %675  ;;  %613 = vmatmul.mubr.msk.f32.vlgmr.msra.gmra.mrb[0].mxu1 %vm168_vm1, %v31_v46  ;;  %653 = vmatprep.subr.bf16.mxu1 %v652_v47 }
  0xf5   :  { %v678_v49 = vpop.eup %677  ;;  %655 = vmatpush3.bf16.msra.mxu1 %v652_v47  ;;  %633 = vmatprep.mubr.msk.f32.mxu1 %vm168_vm1, %v30_v17 }
  0xf6   :  { %v656_v50 = vpack.c.bf16 %v676_v48, %v678_v49 }
  0xf8   :  { %657 = vmatprep.subr.bf16.mxu1 %v656_v50 }
  0xf9   :  { %659 = vmatpush3.bf16.msra.mxu1 %v656_v50 }
  0xfc   :  { %634 = vmatmul.mubr.msk.f32.vlgmr.msra.gmra.mrb[2].mxu1 %vm168_vm1, %v31_v46 }
 0x1c7   :  { %v614_v52 = vpop.f32.mrb[0].mxu1 }
 0x1c8   :  { %v247_v54 = vadd.f32 %v614_v52, %v166_v51  ;;  %v241_v55 = vpop.f32.mrb[1].mxu1 }
 0x1c9   :  { %v242_v56 = vadd.f32 %v241_v55, %v161_v53 }
 0x1ca   :  { %v254_v57 = vsel %vm250_vm2, %v247_v54, -inf }
 0x1cb   :  { %255 = vmax.xlane.f32.xlu1 %v254_v57  ;;  %v251_v58 = vsel %vm250_vm2, %v242_v56, -inf }
 0x1cc   :  { %252 = vmax.xlane.f32.xlu0 %v251_v58 }
 0x1cf   :  { %v635_v59 = vpop.f32.mrb[2].mxu1 }
 0x1d0   :  { %v474_v60 = vpop.f32.mrb[3].mxu1  ;;  %v480_v62 = vadd.f32 %v635_v59, %v166_v51 }
 0x1d1   :  { %v475_v61 = vadd.f32 %v474_v60, %v161_v53 }
 0x1d2   :  { %v486_v2 = vsel %vm250_vm2, %v480_v62, -inf }
 0x1d3   :  { %v483_v63 = vsel %vm250_vm2, %v475_v61, -inf }
 0x1d4   :  { %484 = vmax.xlane.f32.xlu0 %v483_v63 }
 0x1d8   :  { %487 = vmax.xlane.f32.xlu0 %v486_v2 }
 0x258   :  { %v256_v3 = vpop.xlane.xlu1 %255 }
 0x259   :  { %v258_v4 = vsub.f32 %v247_v54, %v256_v3  ;;  %v253_v7 = vpop.xlane.xlu0 %252 }
 0x25a   :  { %v257_v8 = vsub.f32 %v242_v56, %v253_v7 }
 0x25b   :  { %v261_v9 = vmul.f32 1.442695, %v258_v4 }
 0x25c   :  { %v259_v10 = vmul.f32 1.442695, %v257_v8 }
 0x25d   :  { %679 = vpow2.f32 %v261_v9 }
 0x25e   :  { %681 = vpow2.f32 %v259_v10 }
 0x261   :  { %v485_v11 = vpop.xlane.xlu0 %484 }
 0x262   :  { %v489_v12 = vsub.f32 %v475_v61, %v485_v11 }
 0x264   :  { %v491_v13 = vmul.f32 1.442695, %v489_v12 }
 0x265   :  { %v488_v14 = vpop.xlane.xlu0 %487 }
 0x266   :  { %683 = vpow2.f32 %v491_v13  ;;  %v490_v15 = vsub.f32 %v480_v62, %v488_v14 }
 0x267   :  { %v680_v16 = vpop.eup %679 }
 0x268   :  { %v682_v17 = vpop.eup %681  ;;  %v493_v18 = vmul.f32 1.442695, %v490_v15  ;;  %v266_v19 = vsel %vm250_vm2, %v680_v16, 0.0  ;;  %v272_v28 = vmul.f32 %v680_v16, %v747_v1 }
 0x269   :  { %267 = vadd.xlane.f32.xlu0 %v266_v19  ;;  %v263_v20 = vsel %vm250_vm2, %v682_v17, 0.0  ;;  %v271_v23 = vmul.f32 %v682_v17, %v742_v0 }
 0x26a   :  { %685 = vpow2.f32 %v493_v18  ;;  %264 = vadd.xlane.f32.xlu1 %v263_v20  ;;  %v276_v30 = vsel %vm250_vm2, %v272_v28, 0.0  ;;  %v282_v32 = vmul.f32 %v272_v28, %v747_v1 }
 0x26b   :  { %v273_v25 = vsel %vm250_vm2, %v271_v23, 0.0  ;;  %v281_v27 = vmul.f32 %v271_v23, %v742_v0 }
 0x26c   :  { %v286_v34 = vsel %vm250_vm2, %v282_v32, 0.0 }
 0x26d   :  { %v283_v29 = vsel %vm250_vm2, %v281_v27, 0.0 }
 0x270   :  { %v684_v21 = vpop.eup %683 }
 0x271   :  { %v495_v22 = vsel %vm250_vm2, %v684_v21, 0.0  ;;  %v503_v31 = vmul.f32 %v684_v21, %v758_v5 }
 0x272   :  { %496 = vadd.xlane.f32.xlu1 %v495_v22 }
 0x273   :  { %v505_v33 = vsel %vm250_vm2, %v503_v31, 0.0  ;;  %v513_v0 = vmul.f32 %v758_v5, %v503_v31 }
 0x274   :  { %v686_v24 = vpop.eup %685 }
 0x275   :  { %v498_v26 = vsel %vm250_vm2, %v686_v24, 0.0  ;;  %v504_v35 = vmul.f32 %v686_v24, %v763_v6  ;;  %v515_v36 = vsel %vm250_vm2, %v513_v0, 0.0 }
 0x276   :  { %274 = vadd.xlane.f32.xlu1 %v273_v25  ;;  %499 = vadd.xlane.f32.xlu0 %v498_v26 }
 0x277   :  { %v508_v37 = vsel %vm250_vm2, %v504_v35, 0.0  ;;  %v514_v38 = vmul.f32 %v763_v6, %v504_v35 }
 0x279   :  { %v518_v1 = vsel %vm250_vm2, %v514_v38, 0.0 }
 0x27a   :  { %284 = vadd.xlane.f32.xlu1 %v283_v29  ;;  %277 = vadd.xlane.f32.xlu0 %v276_v30 }
 0x27e   :  { %506 = vadd.xlane.f32.xlu1 %v505_v33  ;;  %287 = vadd.xlane.f32.xlu0 %v286_v34 }
 0x282   :  { %516 = vadd.xlane.f32.xlu1 %v515_v36  ;;  %509 = vadd.xlane.f32.xlu0 %v508_v37 }
 0x286   :  { %519 = vadd.xlane.f32.xlu0 %v518_v1 }
 0x2f6   :  { %v268_v40 = vpop.xlane.xlu0 %267 }
 0x2f7   :  { %v265_v39 = vpop.xlane.xlu1 %264 }
 0x2f8   :  { %687 = vrcp.f32 %v265_v39 }
 0x2f9   :  { %689 = vrcp.f32 %v268_v40 }
 0x2ff   :  { %v497_v5 = vpop.xlane.xlu1 %496 }
 0x300   :  { %691 = vrcp.f32 %v497_v5 }
 0x302   :  { %v688_v41 = vpop.eup %687 }
 0x303   :  { %v275_v42 = vpop.xlane.xlu1 %274  ;;  %v500_v43 = vpop.xlane.xlu0 %499 }
 0x304   :  { %v279_v44 = vmul.f32 %v688_v41, %v275_v42  ;;  %693 = vrcp.f32 %v500_v43  ;;  %v690_v6 = vpop.eup %689 }
 0x306   :  { %312 = vst.msk [vmem:[%s872_s5] sm:$0xff] %vm311_vm3, %v279_v44  ;;  %v291_v47 = vmul.f32 %v279_v44, %v279_v44 }
 0x307   :  { %v285_v45 = vpop.xlane.xlu1 %284  ;;  %v278_v46 = vpop.xlane.xlu0 %277 }
 0x308   :  { %v289_v48 = vmul.f32 %v688_v41, %v285_v45  ;;  %v280_v49 = vmul.f32 %v690_v6, %v278_v46 }
 0x30a   :  { %v692_v50 = vpop.eup %691  ;;  %v293_v51 = vsub.f32 %v289_v48, %v291_v47  ;;  %313 = vst.msk [vmem:[%s872_s5 + $0x8] sm:$0xff] %vm311_vm3, %v280_v49  ;;  %v292_v57 = vmul.f32 %v280_v49, %v280_v49 }
 0x30b   :  { %v507_v52 = vpop.xlane.xlu1 %506  ;;  %v288_v53 = vpop.xlane.xlu0 %287 }
 0x30c   :  { %v295_v54 = vmax.f32 %v293_v51, 1e-06  ;;  %v511_v55 = vmul.f32 %v692_v50, %v507_v52  ;;  %v290_v56 = vmul.f32 %v690_v6, %v288_v53 }
 0x30e   :  { %v694_v58 = vpop.eup %693  ;;  %695 = vrsqrt.f32 %v295_v54  ;;  %544 = vst.msk [vmem:[%s872_s5] sm:$0xff] %vm543_vm4, %v511_v55  ;;  %v294_v59 = vsub.f32 %v290_v56, %v292_v57  ;;  %v523_v62 = vmul.f32 %v511_v55, %v511_v55  ;;  %vm299_vm5 = vcmp.eq.f32.partialorder %v295_v54, inf }
 0x30f   :  { %v517_v60 = vpop.xlane.xlu1 %516  ;;  %v510_v61 = vpop.xlane.xlu0 %509  ;;  %v302_v15 = vand.u32 2147483648, %v295_v54  ;;  %vm301_vm6 = vcmp.eq.f32.partialorder %v295_v54, 0.0 }
 0x310   :  { %v521_v63 = vmul.f32 %v692_v50, %v517_v60  ;;  %v512_v2 = vmul.f32 %v694_v58, %v510_v61  ;;  %v296_v3 = vmax.f32 %v294_v59, 1e-06 }
 0x312   :  { %v525_v4 = vsub.f32 %v521_v63, %v523_v62  ;;  %545 = vst.msk [vmem:[%s872_s5 + $0x8] sm:$0xff] %vm543_vm4, %v512_v2  ;;  %697 = vrsqrt.f32 %v296_v3  ;;  %v524_v10 = vmul.f32 %v512_v2, %v512_v2  ;;  %vm306_vm7 = vcmp.eq.f32.partialorder %v296_v3, inf }
 0x313   :  { %v520_v7 = vpop.xlane.xlu0 %519  ;;  %v309_v20 = vand.u32 2147483648, %v296_v3  ;;  %vm308_vm8 = vcmp.eq.f32.partialorder %v296_v3, 0.0 }
 0x314   :  { %v527_v8 = vmax.f32 %v525_v4, 1e-06  ;;  %v522_v9 = vmul.f32 %v694_v58, %v520_v7 }
 0x316   :  { %699 = vrsqrt.f32 %v527_v8  ;;  %v526_v11 = vsub.f32 %v522_v9, %v524_v10  ;;  %vm531_vm9 = vcmp.eq.f32.partialorder %v527_v8, inf  ;;  %v534_v25 = vand.u32 2147483648, %v527_v8 }
 0x317   :  { %vm533_vm10 = vcmp.eq.f32.partialorder %v527_v8, 0.0 }
 0x318   :  { %v696_v12 = vpop.eup %695  ;;  %v528_v14 = vmax.f32 %v526_v11, 1e-06 }
 0x319   :  { %v298_v13 = vmul.f32 %v696_v12, %v295_v54 }
 0x31a   :  { %701 = vrsqrt.f32 %v528_v14  ;;  %vm538_vm11 = vcmp.eq.f32.partialorder %v528_v14, inf  ;;  %v541_v30 = vand.u32 2147483648, %v528_v14  ;;  %vm540_vm12 = vcmp.eq.f32.partialorder %v528_v14, 0.0 }
 0x31b   :  { %v300_v16 = vsel %vm299_vm5, %v295_v54, %v298_v13 }
 0x31c   :  { %v303_v17 = vsel %vm301_vm6, %v302_v15, %v300_v16  ;;  %v698_v18 = vpop.eup %697 }
 0x31d   :  { %314 = vst.msk [vmem:[%s873_s6] sm:$0xff] %vm311_vm3, %v303_v17  ;;  %v305_v19 = vmul.f32 %v698_v18, %v296_v3 }
 0x31f   :  { %v307_v22 = vsel %vm306_vm7, %v296_v3, %v305_v19 }
 0x320   :  { %v700_v21 = vpop.eup %699  ;;  %v310_v23 = vsel %vm308_vm8, %v309_v20, %v307_v22 }
 0x321   :  { %v530_v24 = vmul.f32 %v700_v21, %v527_v8  ;;  %315 = vst.msk [vmem:[%s873_s6 + $0x8] sm:$0xff] %vm311_vm3, %v310_v23 }
 0x323   :  { %v532_v26 = vsel %vm531_vm9, %v527_v8, %v530_v24 }
 0x324   :  { %v535_v27 = vsel %vm533_vm10, %v534_v25, %v532_v26  ;;  %v702_v28 = vpop.eup %701 }
 0x325   :  { %546 = vst.msk [vmem:[%s873_s6] sm:$0xff] %vm543_vm4, %v535_v27  ;;  %v537_v29 = vmul.f32 %v702_v28, %v528_v14 }
 0x327   :  { %v539_v31 = vsel %vm538_vm11, %v528_v14, %v537_v29 }
 0x328   :  { %v542_v32 = vsel %vm540_vm12, %v541_v30, %v539_v31 }
 0x329   :  { %547 = vst.msk [vmem:[%s873_s6 + $0x8] sm:$0xff] %vm543_vm4, %v542_v32 }

</bundles_post_ra>
